<compile_context>
chip_gen: v5e
topology: v5e:2x2
jax: 0.10.0
libtpu: 0.0.40
codegen_flags: <defaults>
</compile_context>

<pallas_src>
import functools

import jax
import jax.numpy as jnp
from jax import lax
from jax.experimental import pallas as pl
from jax.experimental.pallas import tpu as pltpu

EPS = 1e-5


def _cshift(a, shift, size):
    # Circular shift along the lane axis: out[..., k] = a[..., (k - shift) % size].
    # Shift is normalized to [0, size) so only non-negative rolls are emitted.
    return pltpu.roll(a, shift % size, axis=1)


def _conv3x3_reflect(a, w, masks, W):
    """3x3 conv with reflection pad 1 on a lane-dense (Cin, H*W) activation.

    a:     (Cin, H*W) float32.
    w:     (Cout, 9*Cin) with layout w[co, (di*3+dj)*Cin + ci]   (im2col path), or
           (9, Cout, Cin) with layout w[di*3+dj, co, ci]          (per-tap path).
    masks: (is_col0, is_colW, is_row0, is_rowH) boolean (Cin, H*W) reflection masks,
           computed once per kernel invocation and shared by both convs.
    Returns (Cout, H*W) float32.  Bias-free: the following InstanceNorm cancels it.
    """
    C, HW = a.shape
    is_col0, is_colW, is_row0, is_rowH = masks

    # Column (W-direction) shifts with reflected border, built from 2 lane rolls.
    r_p1 = _cshift(a, 1, HW)      # [k] = a[k-1]
    r_m1 = _cshift(a, -1, HW)     # [k] = a[k+1]
    x_l = jnp.where(is_col0, r_m1, r_p1)   # value at column j-1 (reflected)
    x_r = jnp.where(is_colW, r_p1, r_m1)   # value at column j+1 (reflected)

    im2col_mode = (w.ndim == 2)
    taps = [None] * 9                      # tap index t = di*3 + dj
    acc = None
    for dj, av in enumerate((x_l, a, x_r)):
        # Row (H-direction) shifts with reflected border for this column variant.
        r_pw = _cshift(av, W, HW)          # [k] = av[k-W]  (row i-1)
        r_mw = _cshift(av, -W, HW)         # [k] = av[k+W]  (row i+1)
        for di, tap in ((0, jnp.where(is_row0, r_mw, r_pw)),   # row i-1 reflected
                        (1, av),                               # row i
                        (2, jnp.where(is_rowH, r_pw, r_mw))):  # row i+1 reflected
            t = di * 3 + dj
            if im2col_mode:
                taps[t] = tap
            else:
                # Consume each tap immediately -> at most a few taps live at once.
                d = jnp.dot(w[t], tap.astype(w.dtype),
                            preferred_element_type=jnp.float32)
                acc = d if acc is None else acc + d

    if im2col_mode:
        # Single big-K MXU matmul over a (9*Cin, H*W) im2col slab.
        im2col = jnp.concatenate(taps, axis=0).astype(w.dtype)
        return jnp.dot(w, im2col, preferred_element_type=jnp.float32)
    return acc


def _instance_norm(a):
    # a: (C, H*W); per-channel stats over spatial, biased variance, eps=1e-5.
    inv_hw = 1.0 / a.shape[1]
    mean = jnp.sum(a, axis=1, keepdims=True) * inv_hw
    centered = a - mean
    var = jnp.sum(centered * centered, axis=1, keepdims=True) * inv_hw
    return centered * lax.rsqrt(var + EPS)


def residual_block_kernel(x_ref, w1_ref, w2_ref, o_ref, *, H, W):
    x = x_ref[0].astype(jnp.float32)          # (C, H*W), lane-dense
    w1 = w1_ref[...]
    w2 = w2_ref[...]

    # Reflection-boundary masks: computed once, shared by both convs.
    C, HW = x.shape
    k = lax.broadcasted_iota(jnp.int32, (C, HW), 1)   # flat spatial index
    col = k % W
    masks = (col == 0, col == W - 1, k < W, k >= (H - 1) * W)

    # pad -> conv -> IN -> ReLU -> pad -> conv -> IN
    h = jnp.maximum(_instance_norm(_conv3x3_reflect(x, w1, masks, W)), 0.0)
    h = _instance_norm(_conv3x3_reflect(h, w2, masks, W))

    o_ref[0] = (x + h).astype(o_ref.dtype)    # residual add


def residual_block(x, w1, b1, w2, b2, *, mxu_dtype=jnp.float32,
                   im2col_max_bytes=4 * 1024 * 1024):
    """y = x + IN(conv3x3(reflpad(ReLU(IN(conv3x3(reflpad(x))))))), NCHW in/out."""
    N, C, H, W = x.shape
    assert H >= 2 and W >= 2, "reflection pad of 1 needs H, W >= 2"
    HW = H * W

    # Biases dropped on purpose: both convs feed an InstanceNorm whose mean
    # subtraction cancels any per-channel constant exactly.
    del b1, b2

    # Lane-dense layouts prepared in the wrapper (plain XLA, outside the kernel).
    x2 = x.reshape(N, C, HW)

    # im2col (single big-K matmul) only when channels are sublane-aligned AND the
    # (9C, HW) slab stays within a modest VMEM budget; otherwise per-tap dots
    # (K = C is already MXU-friendly for large C, and liveness stays low).
    use_im2col = (C % 8 == 0) and (9 * C * HW * 4 <= im2col_max_bytes)
    if use_im2col:
        # (Cout, Cin, 3, 3) -> (Cout, 9*Cin), tap-major / ci-minor ordering.
        w1f = jnp.transpose(w1, (0, 2, 3, 1)).reshape(C, 9 * C).astype(mxu_dtype)
        w2f = jnp.transpose(w2, (0, 2, 3, 1)).reshape(C, 9 * C).astype(mxu_dtype)
        w_spec = pl.BlockSpec((C, 9 * C), lambda n: (0, 0))
    else:
        # (Cout, Cin, 3, 3) -> (9, Cout, Cin) for the per-tap path.
        w1f = jnp.transpose(w1, (2, 3, 0, 1)).reshape(9, C, C).astype(mxu_dtype)
        w2f = jnp.transpose(w2, (2, 3, 0, 1)).reshape(9, C, C).astype(mxu_dtype)
        w_spec = pl.BlockSpec((9, C, C), lambda n: (0, 0, 0))

    kernel = functools.partial(residual_block_kernel, H=H, W=W)

    out = pl.pallas_call(
        kernel,
        out_shape=jax.ShapeDtypeStruct((N, C, HW), x.dtype),
        grid_spec=pltpu.PrefetchScalarGridSpec(
            num_scalar_prefetch=0,
            grid=(N,),
            in_specs=[
                pl.BlockSpec((1, C, HW), lambda n: (n, 0, 0)),
                w_spec,
                w_spec,
            ],
            out_specs=pl.BlockSpec((1, C, HW), lambda n: (n, 0, 0)),
        ),
        compiler_params=pltpu.CompilerParams(
            dimension_semantics=("parallel",),
            vmem_limit_bytes=32 * 1024 * 1024,
        ),
    )(x2, w1f, w2f)
    # TODO(synk): for very large C*H*W (e.g. C=256 at 64x64 on v7x's 64 MiB VMEM),
    # split H*W (halo rows + two-pass IN stats) across a second "parallel" grid axis
    # so both v7x TensorCores stay busy within a single image.
    return out.reshape(N, C, H, W)


def residual_block_ref(x, w1, b1, w2, b2):
    # pure-JAX reference matching PyTorch semantics (biases included).
    def conv(a, w, b):
        ap = jnp.pad(a, ((0, 0), (0, 0), (1, 1), (1, 1)), mode="reflect")
        y = lax.conv_general_dilated(
            ap, w, window_strides=(1, 1), padding="VALID",
            dimension_numbers=("NCHW", "OIHW", "NCHW"))
        return y + b[None, :, None, None]

    def inorm(a):
        mean = jnp.mean(a, axis=(2, 3), keepdims=True)
        var = jnp.mean((a - mean) ** 2, axis=(2, 3), keepdims=True)
        return (a - mean) / jnp.sqrt(var + EPS)

    h = jnp.maximum(inorm(conv(x, w1, b1)), 0.0)
    h = inorm(conv(h, w2, b2))
    return x + h


def _run_case(key, N, C, H, W, **kw):
    kx, kw1, kb1, kw2, kb2 = jax.random.split(key, 5)
    x = jax.random.normal(kx, (N, C, H, W), dtype=jnp.float32)

    # deterministic PyTorch-like uniform init, bound 1/sqrt(fan_in), fan_in = C*3*3
    bound = 1.0 / jnp.sqrt(C * 3.0 * 3.0)
    w1 = jax.random.uniform(kw1, (C, C, 3, 3), jnp.float32, -bound, bound)
    b1 = jax.random.uniform(kb1, (C,), jnp.float32, -bound, bound)
    w2 = jax.random.uniform(kw2, (C, C, 3, 3), jnp.float32, -bound, bound)
    b2 = jax.random.uniform(kb2, (C,), jnp.float32, -bound, bound)

    out = jax.block_until_ready(residual_block(x, w1, b1, w2, b2, **kw))
    ref = residual_block_ref(x, w1, b1, w2, b2)
    assert out.shape == (N, C, H, W)
    assert jnp.allclose(out, ref, atol=2e-4, rtol=2e-4), f"mismatch vs reference (C={C}, {kw})"


if __name__ == "__main__":
    key = jax.random.PRNGKey(0)
    k1, k2, k3 = jax.random.split(key, 3)
    _run_case(k1, N=2, C=4, H=16, W=16)                       # unaligned-C per-tap path
    _run_case(k2, N=2, C=8, H=16, W=16)                       # aligned-C im2col path
    _run_case(k3, N=2, C=8, H=16, W=16, im2col_max_bytes=0)   # aligned-C per-tap (large-C policy)
    print("KERNEL_OK")
</pallas_src>

<mosaic_0001>
module attributes {stable_mosaic.version = 11 : i64} {
  func.func @residual_block_kernel(%arg0: i32, %arg1: memref<1x4x256xf32, #tpu.memory_space<vmem>>, %arg2: memref<9x4x4xf32, #tpu.memory_space<vmem>>, %arg3: memref<9x4x4xf32, #tpu.memory_space<vmem>>, %arg4: memref<1x4x256xf32, #tpu.memory_space<vmem>>) attributes {dimension_semantics = [#tpu.dimension_semantics<parallel>], iteration_bounds = array<i64: 2>, scalar_prefetch = 0 : i64, scratch_operands = 0 : i64, tpu.core_type = #tpu.core_type<tc>, window_params = [{transform_indices = @transform_0, window_bounds = array<i64: 1, 4, 256>}, {pipeline_mode = #tpu.pipeline_mode<synchronous>, transform_indices = @transform_1, window_bounds = array<i64: 9, 4, 4>}, {pipeline_mode = #tpu.pipeline_mode<synchronous>, transform_indices = @transform_2, window_bounds = array<i64: 9, 4, 4>}, {transform_indices = @transform_3, window_bounds = array<i64: 1, 4, 256>}]} {
    %c0 = arith.constant 0 : index
    %c0_0 = arith.constant 0 : index
    %c0_1 = arith.constant 0 : index
    %0 = vector.load %arg1[%c0, %c0_0, %c0_1] : memref<1x4x256xf32, #tpu.memory_space<vmem>>, vector<1x4x256xf32>
    %1 = vector.shape_cast %0 : vector<1x4x256xf32> to vector<4x256xf32>
    %c0_2 = arith.constant 0 : index
    %c0_3 = arith.constant 0 : index
    %c0_4 = arith.constant 0 : index
    %2 = vector.load %arg2[%c0_2, %c0_3, %c0_4] : memref<9x4x4xf32, #tpu.memory_space<vmem>>, vector<9x4x4xf32>
    %c0_5 = arith.constant 0 : index
    %c0_6 = arith.constant 0 : index
    %c0_7 = arith.constant 0 : index
    %3 = vector.load %arg3[%c0_5, %c0_6, %c0_7] : memref<9x4x4xf32, #tpu.memory_space<vmem>>, vector<9x4x4xf32>
    %4 = tpu.iota {dimensions = array<i32: 1>} : vector<4x256xi32>
    %c16_i32 = arith.constant 16 : i32
    %c0_i32 = arith.constant 0 : i32
    %5 = arith.cmpi eq, %c16_i32, %c0_i32 : i32
    %c1_i32 = arith.constant 1 : i32
    %6 = arith.select %5, %c1_i32, %c16_i32 : i32
    %7 = vector.broadcast %6 : i32 to vector<4x256xi32>
    %8 = arith.remsi %4, %7 : vector<4x256xi32>
    %c0_i32_8 = arith.constant 0 : i32
    %9 = vector.broadcast %c0_i32_8 : i32 to vector<4x256xi32>
    %10 = arith.cmpi ne, %8, %9 : vector<4x256xi32>
    %c0_i32_9 = arith.constant 0 : i32
    %11 = vector.broadcast %c0_i32_9 : i32 to vector<4x256xi32>
    %12 = arith.cmpi slt, %8, %11 : vector<4x256xi32>
    %c0_i32_10 = arith.constant 0 : i32
    %13 = arith.cmpi slt, %6, %c0_i32_10 : i32
    %14 = vector.broadcast %13 : i1 to vector<4x256xi1>
    %15 = vector.broadcast %14 : vector<4x256xi1> to vector<4x256xi1>
    %16 = arith.xori %12, %15 : vector<4x256xi1>
    %17 = arith.andi %16, %10 : vector<4x256xi1>
    %18 = vector.broadcast %6 : i32 to vector<4x256xi32>
    %19 = arith.addi %8, %18 : vector<4x256xi32>
    %20 = arith.select %17, %19, %8 : vector<4x256xi1>, vector<4x256xi32>
    %c0_i32_11 = arith.constant 0 : i32
    %21 = vector.broadcast %c0_i32_11 : i32 to vector<4x256xi32>
    %22 = arith.cmpi eq, %20, %21 : vector<4x256xi32>
    %c15_i32 = arith.constant 15 : i32
    %23 = vector.broadcast %c15_i32 : i32 to vector<4x256xi32>
    %24 = arith.cmpi eq, %20, %23 : vector<4x256xi32>
    %c16_i32_12 = arith.constant 16 : i32
    %25 = vector.broadcast %c16_i32_12 : i32 to vector<4x256xi32>
    %26 = arith.cmpi slt, %4, %25 : vector<4x256xi32>
    %c240_i32 = arith.constant 240 : i32
    %27 = vector.broadcast %c240_i32 : i32 to vector<4x256xi32>
    %28 = arith.cmpi sge, %4, %27 : vector<4x256xi32>
    %c1_i32_13 = arith.constant 1 : i32
    %29 = tpu.dynamic_rotate %1 by %c1_i32_13 dim 1 : vector<4x256xf32>, i32 -> vector<4x256xf32>
    %c255_i32 = arith.constant 255 : i32
    %30 = tpu.dynamic_rotate %1 by %c255_i32 dim 1 : vector<4x256xf32>, i32 -> vector<4x256xf32>
    %31 = arith.select %22, %30, %29 : vector<4x256xi1>, vector<4x256xf32>
    %32 = arith.select %24, %29, %30 : vector<4x256xi1>, vector<4x256xf32>
    %c16_i32_14 = arith.constant 16 : i32
    %33 = tpu.dynamic_rotate %31 by %c16_i32_14 dim 1 : vector<4x256xf32>, i32 -> vector<4x256xf32>
    %c240_i32_15 = arith.constant 240 : i32
    %34 = tpu.dynamic_rotate %31 by %c240_i32_15 dim 1 : vector<4x256xf32>, i32 -> vector<4x256xf32>
    %35 = arith.select %26, %34, %33 : vector<4x256xi1>, vector<4x256xf32>
    %36 = arith.select %28, %33, %34 : vector<4x256xi1>, vector<4x256xf32>
    %37 = vector.extract_strided_slice %2 {offsets = [0, 0, 0], sizes = [1, 4, 4], strides = [1, 1, 1]} : vector<9x4x4xf32> to vector<1x4x4xf32>
    %38 = vector.shape_cast %37 : vector<1x4x4xf32> to vector<4x4xf32>
    %cst = arith.constant dense<0.000000e+00> : vector<4x256xf32>
    %39 = tpu.matmul %38, %35, %cst {dimension_numbers = #tpu.dot_dimension_numbers<[1], [0], [0], [1], [0, 0, 1, 1], [], []>} : vector<4x4xf32>, vector<4x256xf32>, vector<4x256xf32> -> vector<4x256xf32>
    %40 = vector.extract_strided_slice %2 {offsets = [3, 0, 0], sizes = [1, 4, 4], strides = [1, 1, 1]} : vector<9x4x4xf32> to vector<1x4x4xf32>
    %41 = vector.shape_cast %40 : vector<1x4x4xf32> to vector<4x4xf32>
    %cst_16 = arith.constant dense<0.000000e+00> : vector<4x256xf32>
    %42 = tpu.matmul %41, %31, %cst_16 {dimension_numbers = #tpu.dot_dimension_numbers<[1], [0], [0], [1], [0, 0, 1, 1], [], []>} : vector<4x4xf32>, vector<4x256xf32>, vector<4x256xf32> -> vector<4x256xf32>
    %43 = arith.addf %39, %42 : vector<4x256xf32>
    %44 = vector.extract_strided_slice %2 {offsets = [6, 0, 0], sizes = [1, 4, 4], strides = [1, 1, 1]} : vector<9x4x4xf32> to vector<1x4x4xf32>
    %45 = vector.shape_cast %44 : vector<1x4x4xf32> to vector<4x4xf32>
    %cst_17 = arith.constant dense<0.000000e+00> : vector<4x256xf32>
    %46 = tpu.matmul %45, %36, %cst_17 {dimension_numbers = #tpu.dot_dimension_numbers<[1], [0], [0], [1], [0, 0, 1, 1], [], []>} : vector<4x4xf32>, vector<4x256xf32>, vector<4x256xf32> -> vector<4x256xf32>
    %47 = arith.addf %43, %46 : vector<4x256xf32>
    %c16_i32_18 = arith.constant 16 : i32
    %48 = tpu.dynamic_rotate %1 by %c16_i32_18 dim 1 : vector<4x256xf32>, i32 -> vector<4x256xf32>
    %c240_i32_19 = arith.constant 240 : i32
    %49 = tpu.dynamic_rotate %1 by %c240_i32_19 dim 1 : vector<4x256xf32>, i32 -> vector<4x256xf32>
    %50 = arith.select %26, %49, %48 : vector<4x256xi1>, vector<4x256xf32>
    %51 = arith.select %28, %48, %49 : vector<4x256xi1>, vector<4x256xf32>
    %52 = vector.extract_strided_slice %2 {offsets = [1, 0, 0], sizes = [1, 4, 4], strides = [1, 1, 1]} : vector<9x4x4xf32> to vector<1x4x4xf32>
    %53 = vector.shape_cast %52 : vector<1x4x4xf32> to vector<4x4xf32>
    %cst_20 = arith.constant dense<0.000000e+00> : vector<4x256xf32>
    %54 = tpu.matmul %53, %50, %cst_20 {dimension_numbers = #tpu.dot_dimension_numbers<[1], [0], [0], [1], [0, 0, 1, 1], [], []>} : vector<4x4xf32>, vector<4x256xf32>, vector<4x256xf32> -> vector<4x256xf32>
    %55 = arith.addf %47, %54 : vector<4x256xf32>
    %56 = vector.extract_strided_slice %2 {offsets = [4, 0, 0], sizes = [1, 4, 4], strides = [1, 1, 1]} : vector<9x4x4xf32> to vector<1x4x4xf32>
    %57 = vector.shape_cast %56 : vector<1x4x4xf32> to vector<4x4xf32>
    %cst_21 = arith.constant dense<0.000000e+00> : vector<4x256xf32>
    %58 = tpu.matmul %57, %1, %cst_21 {dimension_numbers = #tpu.dot_dimension_numbers<[1], [0], [0], [1], [0, 0, 1, 1], [], []>} : vector<4x4xf32>, vector<4x256xf32>, vector<4x256xf32> -> vector<4x256xf32>
    %59 = arith.addf %55, %58 : vector<4x256xf32>
    %60 = vector.extract_strided_slice %2 {offsets = [7, 0, 0], sizes = [1, 4, 4], strides = [1, 1, 1]} : vector<9x4x4xf32> to vector<1x4x4xf32>
    %61 = vector.shape_cast %60 : vector<1x4x4xf32> to vector<4x4xf32>
    %cst_22 = arith.constant dense<0.000000e+00> : vector<4x256xf32>
    %62 = tpu.matmul %61, %51, %cst_22 {dimension_numbers = #tpu.dot_dimension_numbers<[1], [0], [0], [1], [0, 0, 1, 1], [], []>} : vector<4x4xf32>, vector<4x256xf32>, vector<4x256xf32> -> vector<4x256xf32>
    %63 = arith.addf %59, %62 : vector<4x256xf32>
    %c16_i32_23 = arith.constant 16 : i32
    %64 = tpu.dynamic_rotate %32 by %c16_i32_23 dim 1 : vector<4x256xf32>, i32 -> vector<4x256xf32>
    %c240_i32_24 = arith.constant 240 : i32
    %65 = tpu.dynamic_rotate %32 by %c240_i32_24 dim 1 : vector<4x256xf32>, i32 -> vector<4x256xf32>
    %66 = arith.select %26, %65, %64 : vector<4x256xi1>, vector<4x256xf32>
    %67 = arith.select %28, %64, %65 : vector<4x256xi1>, vector<4x256xf32>
    %68 = vector.extract_strided_slice %2 {offsets = [2, 0, 0], sizes = [1, 4, 4], strides = [1, 1, 1]} : vector<9x4x4xf32> to vector<1x4x4xf32>
    %69 = vector.shape_cast %68 : vector<1x4x4xf32> to vector<4x4xf32>
    %cst_25 = arith.constant dense<0.000000e+00> : vector<4x256xf32>
    %70 = tpu.matmul %69, %66, %cst_25 {dimension_numbers = #tpu.dot_dimension_numbers<[1], [0], [0], [1], [0, 0, 1, 1], [], []>} : vector<4x4xf32>, vector<4x256xf32>, vector<4x256xf32> -> vector<4x256xf32>
    %71 = arith.addf %63, %70 : vector<4x256xf32>
    %72 = vector.extract_strided_slice %2 {offsets = [5, 0, 0], sizes = [1, 4, 4], strides = [1, 1, 1]} : vector<9x4x4xf32> to vector<1x4x4xf32>
    %73 = vector.shape_cast %72 : vector<1x4x4xf32> to vector<4x4xf32>
    %cst_26 = arith.constant dense<0.000000e+00> : vector<4x256xf32>
    %74 = tpu.matmul %73, %32, %cst_26 {dimension_numbers = #tpu.dot_dimension_numbers<[1], [0], [0], [1], [0, 0, 1, 1], [], []>} : vector<4x4xf32>, vector<4x256xf32>, vector<4x256xf32> -> vector<4x256xf32>
    %75 = arith.addf %71, %74 : vector<4x256xf32>
    %76 = vector.extract_strided_slice %2 {offsets = [8, 0, 0], sizes = [1, 4, 4], strides = [1, 1, 1]} : vector<9x4x4xf32> to vector<1x4x4xf32>
    %77 = vector.shape_cast %76 : vector<1x4x4xf32> to vector<4x4xf32>
    %cst_27 = arith.constant dense<0.000000e+00> : vector<4x256xf32>
    %78 = tpu.matmul %77, %67, %cst_27 {dimension_numbers = #tpu.dot_dimension_numbers<[1], [0], [0], [1], [0, 0, 1, 1], [], []>} : vector<4x4xf32>, vector<4x256xf32>, vector<4x256xf32> -> vector<4x256xf32>
    %79 = arith.addf %75, %78 : vector<4x256xf32>
    %cst_28 = arith.constant dense<0.000000e+00> : vector<4xf32>
    %80 = vector.multi_reduction <add>, %79, %cst_28 [1] : vector<4x256xf32> to vector<4xf32>
    %81 = vector.shape_cast %80 : vector<4xf32> to vector<4x1xf32>
    %cst_29 = arith.constant 3.906250e-03 : f32
    %82 = vector.broadcast %cst_29 : f32 to vector<4x1xf32>
    %83 = arith.mulf %81, %82 : vector<4x1xf32>
    %84 = vector.broadcast %83 : vector<4x1xf32> to vector<4x256xf32>
    %85 = arith.subf %79, %84 : vector<4x256xf32>
    %86 = arith.mulf %85, %85 : vector<4x256xf32>
    %cst_30 = arith.constant dense<0.000000e+00> : vector<4xf32>
    %87 = vector.multi_reduction <add>, %86, %cst_30 [1] : vector<4x256xf32> to vector<4xf32>
    %88 = vector.shape_cast %87 : vector<4xf32> to vector<4x1xf32>
    %cst_31 = arith.constant 3.906250e-03 : f32
    %89 = vector.broadcast %cst_31 : f32 to vector<4x1xf32>
    %90 = arith.mulf %88, %89 : vector<4x1xf32>
    %cst_32 = arith.constant 9.99999974E-6 : f32
    %91 = vector.broadcast %cst_32 : f32 to vector<4x1xf32>
    %92 = arith.addf %90, %91 : vector<4x1xf32>
    %93 = math.rsqrt %92 : vector<4x1xf32>
    %94 = vector.broadcast %93 : vector<4x1xf32> to vector<4x256xf32>
    %95 = arith.mulf %85, %94 : vector<4x256xf32>
    %cst_33 = arith.constant 0.000000e+00 : f32
    %96 = vector.broadcast %cst_33 : f32 to vector<4x256xf32>
    %97 = arith.maximumf %95, %96 : vector<4x256xf32>
    %c1_i32_34 = arith.constant 1 : i32
    %98 = tpu.dynamic_rotate %97 by %c1_i32_34 dim 1 : vector<4x256xf32>, i32 -> vector<4x256xf32>
    %c255_i32_35 = arith.constant 255 : i32
    %99 = tpu.dynamic_rotate %97 by %c255_i32_35 dim 1 : vector<4x256xf32>, i32 -> vector<4x256xf32>
    %100 = arith.select %22, %99, %98 : vector<4x256xi1>, vector<4x256xf32>
    %101 = arith.select %24, %98, %99 : vector<4x256xi1>, vector<4x256xf32>
    %c16_i32_36 = arith.constant 16 : i32
    %102 = tpu.dynamic_rotate %100 by %c16_i32_36 dim 1 : vector<4x256xf32>, i32 -> vector<4x256xf32>
    %c240_i32_37 = arith.constant 240 : i32
    %103 = tpu.dynamic_rotate %100 by %c240_i32_37 dim 1 : vector<4x256xf32>, i32 -> vector<4x256xf32>
    %104 = arith.select %26, %103, %102 : vector<4x256xi1>, vector<4x256xf32>
    %105 = arith.select %28, %102, %103 : vector<4x256xi1>, vector<4x256xf32>
    %106 = vector.extract_strided_slice %3 {offsets = [0, 0, 0], sizes = [1, 4, 4], strides = [1, 1, 1]} : vector<9x4x4xf32> to vector<1x4x4xf32>
    %107 = vector.shape_cast %106 : vector<1x4x4xf32> to vector<4x4xf32>
    %cst_38 = arith.constant dense<0.000000e+00> : vector<4x256xf32>
    %108 = tpu.matmul %107, %104, %cst_38 {dimension_numbers = #tpu.dot_dimension_numbers<[1], [0], [0], [1], [0, 0, 1, 1], [], []>} : vector<4x4xf32>, vector<4x256xf32>, vector<4x256xf32> -> vector<4x256xf32>
    %109 = vector.extract_strided_slice %3 {offsets = [3, 0, 0], sizes = [1, 4, 4], strides = [1, 1, 1]} : vector<9x4x4xf32> to vector<1x4x4xf32>
    %110 = vector.shape_cast %109 : vector<1x4x4xf32> to vector<4x4xf32>
    %cst_39 = arith.constant dense<0.000000e+00> : vector<4x256xf32>
    %111 = tpu.matmul %110, %100, %cst_39 {dimension_numbers = #tpu.dot_dimension_numbers<[1], [0], [0], [1], [0, 0, 1, 1], [], []>} : vector<4x4xf32>, vector<4x256xf32>, vector<4x256xf32> -> vector<4x256xf32>
    %112 = arith.addf %108, %111 : vector<4x256xf32>
    %113 = vector.extract_strided_slice %3 {offsets = [6, 0, 0], sizes = [1, 4, 4], strides = [1, 1, 1]} : vector<9x4x4xf32> to vector<1x4x4xf32>
    %114 = vector.shape_cast %113 : vector<1x4x4xf32> to vector<4x4xf32>
    %cst_40 = arith.constant dense<0.000000e+00> : vector<4x256xf32>
    %115 = tpu.matmul %114, %105, %cst_40 {dimension_numbers = #tpu.dot_dimension_numbers<[1], [0], [0], [1], [0, 0, 1, 1], [], []>} : vector<4x4xf32>, vector<4x256xf32>, vector<4x256xf32> -> vector<4x256xf32>
    %116 = arith.addf %112, %115 : vector<4x256xf32>
    %c16_i32_41 = arith.constant 16 : i32
    %117 = tpu.dynamic_rotate %97 by %c16_i32_41 dim 1 : vector<4x256xf32>, i32 -> vector<4x256xf32>
    %c240_i32_42 = arith.constant 240 : i32
    %118 = tpu.dynamic_rotate %97 by %c240_i32_42 dim 1 : vector<4x256xf32>, i32 -> vector<4x256xf32>
    %119 = arith.select %26, %118, %117 : vector<4x256xi1>, vector<4x256xf32>
    %120 = arith.select %28, %117, %118 : vector<4x256xi1>, vector<4x256xf32>
    %121 = vector.extract_strided_slice %3 {offsets = [1, 0, 0], sizes = [1, 4, 4], strides = [1, 1, 1]} : vector<9x4x4xf32> to vector<1x4x4xf32>
    %122 = vector.shape_cast %121 : vector<1x4x4xf32> to vector<4x4xf32>
    %cst_43 = arith.constant dense<0.000000e+00> : vector<4x256xf32>
    %123 = tpu.matmul %122, %119, %cst_43 {dimension_numbers = #tpu.dot_dimension_numbers<[1], [0], [0], [1], [0, 0, 1, 1], [], []>} : vector<4x4xf32>, vector<4x256xf32>, vector<4x256xf32> -> vector<4x256xf32>
    %124 = arith.addf %116, %123 : vector<4x256xf32>
    %125 = vector.extract_strided_slice %3 {offsets = [4, 0, 0], sizes = [1, 4, 4], strides = [1, 1, 1]} : vector<9x4x4xf32> to vector<1x4x4xf32>
    %126 = vector.shape_cast %125 : vector<1x4x4xf32> to vector<4x4xf32>
    %cst_44 = arith.constant dense<0.000000e+00> : vector<4x256xf32>
    %127 = tpu.matmul %126, %97, %cst_44 {dimension_numbers = #tpu.dot_dimension_numbers<[1], [0], [0], [1], [0, 0, 1, 1], [], []>} : vector<4x4xf32>, vector<4x256xf32>, vector<4x256xf32> -> vector<4x256xf32>
    %128 = arith.addf %124, %127 : vector<4x256xf32>
    %129 = vector.extract_strided_slice %3 {offsets = [7, 0, 0], sizes = [1, 4, 4], strides = [1, 1, 1]} : vector<9x4x4xf32> to vector<1x4x4xf32>
    %130 = vector.shape_cast %129 : vector<1x4x4xf32> to vector<4x4xf32>
    %cst_45 = arith.constant dense<0.000000e+00> : vector<4x256xf32>
    %131 = tpu.matmul %130, %120, %cst_45 {dimension_numbers = #tpu.dot_dimension_numbers<[1], [0], [0], [1], [0, 0, 1, 1], [], []>} : vector<4x4xf32>, vector<4x256xf32>, vector<4x256xf32> -> vector<4x256xf32>
    %132 = arith.addf %128, %131 : vector<4x256xf32>
    %c16_i32_46 = arith.constant 16 : i32
    %133 = tpu.dynamic_rotate %101 by %c16_i32_46 dim 1 : vector<4x256xf32>, i32 -> vector<4x256xf32>
    %c240_i32_47 = arith.constant 240 : i32
    %134 = tpu.dynamic_rotate %101 by %c240_i32_47 dim 1 : vector<4x256xf32>, i32 -> vector<4x256xf32>
    %135 = arith.select %26, %134, %133 : vector<4x256xi1>, vector<4x256xf32>
    %136 = arith.select %28, %133, %134 : vector<4x256xi1>, vector<4x256xf32>
    %137 = vector.extract_strided_slice %3 {offsets = [2, 0, 0], sizes = [1, 4, 4], strides = [1, 1, 1]} : vector<9x4x4xf32> to vector<1x4x4xf32>
    %138 = vector.shape_cast %137 : vector<1x4x4xf32> to vector<4x4xf32>
    %cst_48 = arith.constant dense<0.000000e+00> : vector<4x256xf32>
    %139 = tpu.matmul %138, %135, %cst_48 {dimension_numbers = #tpu.dot_dimension_numbers<[1], [0], [0], [1], [0, 0, 1, 1], [], []>} : vector<4x4xf32>, vector<4x256xf32>, vector<4x256xf32> -> vector<4x256xf32>
    %140 = arith.addf %132, %139 : vector<4x256xf32>
    %141 = vector.extract_strided_slice %3 {offsets = [5, 0, 0], sizes = [1, 4, 4], strides = [1, 1, 1]} : vector<9x4x4xf32> to vector<1x4x4xf32>
    %142 = vector.shape_cast %141 : vector<1x4x4xf32> to vector<4x4xf32>
    %cst_49 = arith.constant dense<0.000000e+00> : vector<4x256xf32>
    %143 = tpu.matmul %142, %101, %cst_49 {dimension_numbers = #tpu.dot_dimension_numbers<[1], [0], [0], [1], [0, 0, 1, 1], [], []>} : vector<4x4xf32>, vector<4x256xf32>, vector<4x256xf32> -> vector<4x256xf32>
    %144 = arith.addf %140, %143 : vector<4x256xf32>
    %145 = vector.extract_strided_slice %3 {offsets = [8, 0, 0], sizes = [1, 4, 4], strides = [1, 1, 1]} : vector<9x4x4xf32> to vector<1x4x4xf32>
    %146 = vector.shape_cast %145 : vector<1x4x4xf32> to vector<4x4xf32>
    %cst_50 = arith.constant dense<0.000000e+00> : vector<4x256xf32>
    %147 = tpu.matmul %146, %136, %cst_50 {dimension_numbers = #tpu.dot_dimension_numbers<[1], [0], [0], [1], [0, 0, 1, 1], [], []>} : vector<4x4xf32>, vector<4x256xf32>, vector<4x256xf32> -> vector<4x256xf32>
    %148 = arith.addf %144, %147 : vector<4x256xf32>
    %cst_51 = arith.constant dense<0.000000e+00> : vector<4xf32>
    %149 = vector.multi_reduction <add>, %148, %cst_51 [1] : vector<4x256xf32> to vector<4xf32>
    %150 = vector.shape_cast %149 : vector<4xf32> to vector<4x1xf32>
    %cst_52 = arith.constant 3.906250e-03 : f32
    %151 = vector.broadcast %cst_52 : f32 to vector<4x1xf32>
    %152 = arith.mulf %150, %151 : vector<4x1xf32>
    %153 = vector.broadcast %152 : vector<4x1xf32> to vector<4x256xf32>
    %154 = arith.subf %148, %153 : vector<4x256xf32>
    %155 = arith.mulf %154, %154 : vector<4x256xf32>
    %cst_53 = arith.constant dense<0.000000e+00> : vector<4xf32>
    %156 = vector.multi_reduction <add>, %155, %cst_53 [1] : vector<4x256xf32> to vector<4xf32>
    %157 = vector.shape_cast %156 : vector<4xf32> to vector<4x1xf32>
    %cst_54 = arith.constant 3.906250e-03 : f32
    %158 = vector.broadcast %cst_54 : f32 to vector<4x1xf32>
    %159 = arith.mulf %157, %158 : vector<4x1xf32>
    %cst_55 = arith.constant 9.99999974E-6 : f32
    %160 = vector.broadcast %cst_55 : f32 to vector<4x1xf32>
    %161 = arith.addf %159, %160 : vector<4x1xf32>
    %162 = math.rsqrt %161 : vector<4x1xf32>
    %163 = vector.broadcast %162 : vector<4x1xf32> to vector<4x256xf32>
    %164 = arith.mulf %154, %163 : vector<4x256xf32>
    %165 = arith.addf %1, %164 : vector<4x256xf32>
    %c0_56 = arith.constant 0 : index
    %c0_57 = arith.constant 0 : index
    %c0_58 = arith.constant 0 : index
    %166 = vector.load %arg4[%c0_56, %c0_57, %c0_58] : memref<1x4x256xf32, #tpu.memory_space<vmem>>, vector<1x4x256xf32>
    %167 = vector.shape_cast %166 : vector<1x4x256xf32> to vector<4x256xf32>
    %168 = vector.shape_cast %165 : vector<4x256xf32> to vector<1x4x256xf32>
    tpu.vector_store %arg4[%c0_56, %c0_57, %c0_58], %168 {strides = array<i32>} : memref<1x4x256xf32, #tpu.memory_space<vmem>>, vector<1x4x256xf32>,
    return
  }
  func.func @transform_0(%arg0: i32) -> (i32, i32, i32) {
    %c0_i32 = arith.constant 0 : i32
    %c0_i32_0 = arith.constant 0 : i32
    %c0_i32_1 = arith.constant 0 : i32
    return %arg0, %c0_i32, %c0_i32_0 : i32, i32, i32
  }
  func.func @transform_1(%arg0: i32) -> (i32, i32, i32) {
    %c0_i32 = arith.constant 0 : i32
    %c0_i32_0 = arith.constant 0 : i32
    %c0_i32_1 = arith.constant 0 : i32
    %c0_i32_2 = arith.constant 0 : i32
    return %c0_i32, %c0_i32_0, %c0_i32_1 : i32, i32, i32
  }
  func.func @transform_2(%arg0: i32) -> (i32, i32, i32) {
    %c0_i32 = arith.constant 0 : i32
    %c0_i32_0 = arith.constant 0 : i32
    %c0_i32_1 = arith.constant 0 : i32
    %c0_i32_2 = arith.constant 0 : i32
    return %c0_i32, %c0_i32_0, %c0_i32_1 : i32, i32, i32
  }
  func.func @transform_3(%arg0: i32) -> (i32, i32, i32) {
    %c0_i32 = arith.constant 0 : i32
    %c0_i32_0 = arith.constant 0 : i32
    %c0_i32_1 = arith.constant 0 : i32
    return %arg0, %c0_i32, %c0_i32_0 : i32, i32, i32
  }
}

</mosaic_0001>

<bundles_post_ra>
// kernel: tpu_custom_call.1
= control target key start
LH: loop header
LB: loop body
LE: loop exit
PB: predicated region body
PF: predicated region fallthrough
CT: control target
= control target key end

     0   :  { %8 = vsyncpa [#allocation3], 0  ;;  %s2058_s0 = inlined_call_operand.vmem [shape: f32[2,4,256], index: 0, kind: input, shape index: {}]   ;;  %s2059_s1 = inlined_call_operand.vmem [shape: f32[9,4,4], index: 1, kind: input, shape index: {}]   ;;  %s2060_s2 = inlined_call_operand.vmem [shape: f32[9,4,4], index: 2, kind: input, shape index: {}]   ;;  %s2061_s3 = inlined_call_operand.hbm [shape: f32[2,4,256], index: 3, kind: output, shape index: {}]  }
   0x1   :  { %10 = vsyncpa [#allocation3 + $0x1], 0  ;;  %s1652_s12 = smov 0   ;;  %s1654_s13 = smov 0  }
   0x2   :  { %s1656_s14 = smov 0   ;;  %s1658_s15 = smov 0  }
   0x3 LB: > { %s1673_s16 = sadd.s32 4294967295, %s1626_s15   ;;  %s1431_s17 = sadd.s32 4294967294, %s1626_s15   ;;  %s1626_s15 = sphi %s1658_s15, %s2075_s15   ;;  %s1622_s14 = sphi %s1656_s14, %s2074_s14   ;;  %s1618_s13 = sphi %s1654_s13, %s2073_s13   ;;  %s1614_s12 = sphi %s1652_s12, %s2072_s12  }
   0x4   : > { %s1677_s18 = sadd.s32 1, %s1626_s15   ;;  %s91_s19 = sadd.s32 1, %s1622_s14 }
   0x5   : > { %s88_s20 = ssub.s32 %s1626_s15, %s1677_s18  ;;  %p101_p0 = scmp.ne.s32.totalorder %s1622_s14, %s1618_s13 }
   0x6   : > { %p89_p1 = scmp.eq.s32.totalorder %s88_s20, 0  ;;  %p102_p2 = scmp.eq.s32.totalorder %s1673_s16, 1 }
   0x7   : > { %p107_p3 = scmp.ne.s32.totalorder %s1618_s13, %s1614_s12  ;;  %p108_p4 = scmp.eq.s32.totalorder %s1431_s17, 1 }
   0x8   : > { %s1688_s21 = scalar_select %p89_p1, %s1622_s14, %s91_s19  }
   0x9   : > { %p1690_p5 = por %p102_p2, %p101_p0  ;;  %p1694_p6 = por %p108_p4, %p107_p3 }
   0xa   : > { %p1434_p7 = scmp.ge.s32.totalorder %s1626_s15, 1  ;;  %p140_p8 = scmp.lt.s32.totalorder %s1626_s15, 3 }
   0xc   : > { %p141_p9 = pnand %p1434_p7, %p140_p8 }
   0xd   : > { %p164_p10 = scmp.lt.s32.totalorder (!%p141_p9), %s1673_s16, 1  ;;  %s1628_s29 = smov (!%p141_p9), 1  }
   0xe   : > { %144 = sbr.rel (%p141_p9) target bundleno = 1419 (0x58b), region = 32  ;;  %s1629_s30 = smov (!%p141_p9), 127  }
   0xf   : > { %s1630_s4 = smov (!%p141_p9), 16   ;;  %s1631_s5 = smov (!%p141_p9), 112  }
  0x10   : > { %s1516_s10 = sshll.u32 (!%p141_p9), %s1673_s16, 3 }
  0x11   : > { %s1367_s11 = scalar_lea.hbm (!%p141_p9), %s2061_s3, %s1516_s10 }
  0x12   : > { %s1371_s20 = sshll.u32 (!%p141_p9), %s1367_s11, 4  ;;  %s1372_s20 = int_to_ptr.hbm [resolvable:$true] %s1371_s20 }
  0x13   : > { %s165_s24 = scalar_select %p164_p10, %s1673_s16, 1  ;;  %v188_v7 = vlaneseq  ;;  %vm273_vm4 = vcmask 1043456   ;;  %v173_v30 = vld [vmem:[%s2059_s1 + $0xc] sm:$0xf]  ;;  %vm269_vm7 = vcmask 31744  }
  0x14   : > { %v170_v34 = vld [vmem:[%s2059_s1] sm:$0xf]  ;;  %v176_v41 = vld [vmem:[%s2059_s1 + $0x18] sm:$0xf]  ;;  %v171_v51 = vld [vmem:[%s2059_s1 + $0x4] sm:$0xf] }
  0x15   : > { %s1515_s25 = sshll.u32 %s165_s24, 3  ;;  %v1716_v11 = vand.u32 127, %v188_v7  ;;  %v174_v56 = vld [vmem:[%s2059_s1 + $0x10] sm:$0xf]  ;;  %v177_v59 = vld [vmem:[%s2059_s1 + $0x1c] sm:$0xf] }
  0x16   : > { %s168_s28 = scalar_lea.vmem %s2058_s0, %s1515_s25  ;;  %v172_v61 = vld [vmem:[%s2059_s1 + $0x8] sm:$0xf]  ;;  %v178_v7 = vld [vmem:[%s2059_s1 + $0x20] sm:$0xf]  ;;  %s1578_s24 = sshra.s32 %s1372_s20, 4  ;;  %s1579_s24 = int_to_ptr.hbm [resolvable:$true] %s1578_s24 }
  0x17   : > { %v1705_v0 = vld [vmem:[%s168_s28] sm:$0xff]  ;;  %v1720_v12 = vadd.s32 128, %v1716_v11  ;;  %v195_v15 = vand.u32 15, %v1716_v11  ;;  %vm233_vm0 = vcmp.lt.s32.totalorder %v1716_v11, 1  ;;  %vm245_vm1 = vcmp.lt.s32.totalorder %v1716_v11, 127  ;;  %s1580_s25 = scalar_lea.hbm %s1579_s24, 8  ;;  %p1585_p0 = scmp.lt.s32.totalorder %s1579_s24, %s2061_s3 }
  0x18   : > { %224 = vst [vmem:[#allocation1] ss:$2 sm:$0xff] %v1705_v0  ;;  %vm219_vm8 = vcmp.lt.s32.totalorder %v1716_v11, 16  ;;  %vm262_vm9 = vcmp.lt.s32.totalorder %v1716_v11, 112  ;;  %v187_v11 = vld [vmem:[%s2060_s2 + $0x20] sm:$0xf]  ;;  %p1581_p11 = scmp.ne.s32.totalorder %s1579_s24, %s1580_s25 }
  0x19   : > { %v202_v14 = vand.u32 15, %v1720_v12  ;;  %vm1730_vm3 = vcmp.eq.s32.totalorder %v195_v15, 0  ;;  %vm1758_vm6 = vcmp.eq.s32.totalorder %v195_v15, 15  ;;  %vm222_vm10 = vcmp.ge.s32.totalorder %v1720_v12, 240  ;;  %s1584_s28 = scalar_lea.hbm %s2061_s3, 16 }
  0x1a   : > { %p1582_p12 = pnand %p1581_p11, %p1690_p5  ;;  %p1586_p1 = scmp.lt.s32.totalorder %s1584_s28, %s1580_s25 }
  0x1b   : > { %vm1726_vm2 = vcmp.eq.s32.totalorder %v202_v14, 0  ;;  %vm1754_vm5 = vcmp.eq.s32.totalorder %v202_v14, 15 }
  0x1c   : > { %p1583_p13 = pneg %p1582_p12  ;;  %p1587_p2 = por %p1586_p1, %p1585_p0 }
  0x1e   : > { %p1588_p3 = pnand %p1587_p2, %p1583_p13 }
  0x1f   : > { %v225_v1 = vld.sshfl [vmem:[#allocation1] sm:$0xff pattern:$0x75316420]  ;;  %v226_v2 = vld.sshfl [vmem:[#allocation1 + $0x8] sm:$0xff pattern:$0x75316420] }
  0x20   : > { %229 = vrot.lane.b32.xlu0 %v225_v1, %s1628_s29  ;;  %236 = vst [vmem:[#allocation1] ss:$2 sm:$0xff] %v1705_v0  ;;  %v175_v1 = vld [vmem:[%s2059_s1 + $0x14] sm:$0xf] }
  0x27   : > { %v237_v3 = vld.sshfl [vmem:[#allocation1] sm:$0xff pattern:$0x75316420]  ;;  %v238_v4 = vld.sshfl [vmem:[#allocation1 + $0x8] sm:$0xff pattern:$0x75316420] }
  0x28   : > { %231 = vrot.lane.b32.xlu0 %v226_v2, %s1628_s29  ;;  %241 = vrot.lane.b32.xlu1 %v237_v3, %s1629_s30  ;;  %420 = vst [vmem:[#allocation1] ss:$2 sm:$0xff] %v1705_v0 }
  0x2f   : > { %v421_v5 = vld.sshfl [vmem:[#allocation1] sm:$0xff pattern:$0x75316420]  ;;  %v422_v6 = vld.sshfl [vmem:[#allocation1 + $0x8] sm:$0xff pattern:$0x75316420] }
  0x30   : > { %243 = vrot.lane.b32.xlu1 %v238_v4, %s1629_s30  ;;  %425 = vrot.lane.b32.xlu2 %v421_v5, %s1630_s4  ;;  %431 = vst [vmem:[#allocation1] ss:$2 sm:$0xff] %v1705_v0 }
  0x37   : > { %v432_v9 = vld.sshfl [vmem:[#allocation1] sm:$0xff pattern:$0x75316420]  ;;  %v433_v10 = vld.sshfl [vmem:[#allocation1 + $0x8] sm:$0xff pattern:$0x75316420] }
  0x38   : > { %497 = vst [vmem:[#allocation1] ss:$2 sm:$0xff] %v1705_v0 }
  0x3f   : > { %v499_v44 = vld.sshfl [vmem:[#allocation1 + $0x8] sm:$0xff pattern:$0x75316420]  ;;  %v498_v45 = vld.sshfl [vmem:[#allocation1] sm:$0xff pattern:$0x75316420] }
  0x8a   : > { %v426_v31 = vpop.permute.xlu2 %425 }
  0x92   : > { %v230_v8 = vpop.permute.xlu0 %229 }
  0x9a   : > { %v242_v13 = vpop.permute.xlu1 %241  ;;  %v232_v16 = vpop.permute.xlu0 %231 }
  0x9b   : > { %v234_v20 = vsel %vm233_vm0, %v230_v8, %v232_v16  ;;  %v235_v21 = vsel %vm233_vm0, %v232_v16, %v230_v8 }
  0xa2   : > { %v244_v19 = vpop.permute.xlu1 %243 }
  0xa3   : > { %v246_v22 = vsel %vm245_vm1, %v242_v13, %v244_v19  ;;  %v247_v23 = vsel %vm245_vm1, %v244_v19, %v242_v13 }
  0xa4   : > { %v249_v24 = vsel %vm1726_vm2, %v247_v23, %v234_v20  ;;  %v248_v25 = vsel %vm1730_vm3, %v246_v22, %v235_v21  ;;  %v251_v28 = vsel %vm1754_vm5, %v234_v20, %v247_v23  ;;  %v250_v29 = vsel %vm1758_vm6, %v235_v21, %v246_v22 }
  0xa5   : > { %260 = vrot.lane.b32.xlu1 %v249_v24, %s1631_s5  ;;  %1440 = vmatpush.msk.msra.mxu1 %vm273_vm4, %v249_v24 }
  0xa6   : > { %258 = vrot.lane.b32.xlu0 %v248_v25, %s1631_s5  ;;  %1438 = vmatpush.msk.msra.mxu0 %vm273_vm4, %v248_v25 }
  0xa7   : > { %252 = vrot.lane.b32.xlu2 %v248_v25, %s1630_s4  ;;  %1441 = vmatmul.msk.f32.vlgmr.msra.gmra.mxu1 %vm269_vm7, %v173_v30 }
  0xa8   : > { %1439 = vmatmul.msk.f32.vlgmr.msra.gmra.mxu0 %vm269_vm7, %v173_v30 }
  0xad   : > { %436 = vrot.lane.b32.xlu1 %v432_v9, %s1631_s5 }
  0xae   : > { %427 = vrot.lane.b32.xlu0 %v422_v6, %s1630_s4 }
  0xaf   : > { %254 = vrot.lane.b32.xlu2 %v249_v24, %s1630_s4 }
  0xb5   : > { %602 = vrot.lane.b32.xlu1 %v251_v28, %s1630_s4 }
  0xb6   : > { %600 = vrot.lane.b32.xlu0 %v250_v29, %s1630_s4 }
  0xb7   : > { %438 = vrot.lane.b32.xlu2 %v433_v10, %s1631_s5 }
  0xbe   : > { %608 = vrot.lane.b32.xlu0 %v251_v28, %s1631_s5 }
  0xbf   : > { %606 = vrot.lane.b32.xlu2 %v250_v29, %s1631_s5 }
 0x101   : > { %v253_v32 = vpop.permute.xlu2 %252 }
 0x109   : > { %v255_v33 = vpop.permute.xlu2 %254 }
 0x10a   : > { %v256_v35 = vsel %vm219_vm8, %v253_v32, %v255_v33  ;;  %v257_v38 = vsel %vm219_vm8, %v255_v33, %v253_v32 }
 0x10b   : > { %1444 = vmatpush.msk.msra.mxu3 %vm273_vm4, %v256_v35 }
 0x10c   : > { %1445 = vmatmul.msk.f32.vlgmr.msra.gmra.mxu3 %vm269_vm7, %v170_v34 }
 0x111   : > { %v439_v46 = vpop.permute.xlu2 %438 }
 0x117   : > { %v261_v36 = vpop.permute.xlu1 %260 }
 0x118   : > { %v259_v37 = vpop.permute.xlu0 %258 }
 0x119   : > { %v264_v39 = vsel %vm262_vm9, %v261_v36, %v259_v37  ;;  %v263_v40 = vsel %vm262_vm9, %v259_v37, %v261_v36  ;;  %v607_v62 = vpop.permute.xlu2 %606 }
 0x11a   : > { %1446 = vmatpush.msk.msrb.mxu0 %vm273_vm4, %v263_v40  ;;  %v265_v42 = vsel %vm219_vm8, %v263_v40, %v257_v38  ;;  %v268_v43 = vsel %vm222_vm10, %v256_v35, %v264_v39 }
 0x11b   : > { %1442 = vmatpush.msk.msra.mxu2 %vm273_vm4, %v265_v42  ;;  %1448 = vmatpush.msk.msrb.mxu1 %vm273_vm4, %v268_v43 }
 0x11c   : > { %1443 = vmatmul.msk.f32.vlgmr.msra.gmra.mxu2 %vm269_vm7, %v170_v34  ;;  %1449 = vmatmul.msk.f32.vlgmr.msrb.gmra.mxu1 %vm269_vm7, %v176_v41 }
 0x11d   : > { %1447 = vmatmul.msk.f32.vlgmr.msrb.gmra.mxu0 %vm269_vm7, %v176_v41  ;;  %1456 = vmatpush.msk.msra.mxu1 %vm273_vm4, %v499_v44 }
 0x11e   : > { %1454 = vmatpush.msk.msra.mxu0 %vm273_vm4, %v498_v45 }
 0x11f   : > { %v437_v47 = vpop.permute.xlu1 %436 }
 0x120   : > { %v428_v48 = vpop.permute.xlu0 %427  ;;  %v440_v49 = vsel %vm262_vm9, %v437_v47, %v439_v46  ;;  %v441_v50 = vsel %vm262_vm9, %v439_v46, %v437_v47 }
 0x121   : > { %v430_v52 = vsel %vm219_vm8, %v428_v48, %v426_v31  ;;  %v429_v53 = vsel %vm219_vm8, %v426_v31, %v428_v48 }
 0x122   : > { %v445_v54 = vsel %vm222_vm10, %v429_v53, %v441_v50  ;;  %1452 = vmatpush.msk.msrb.mxu3 %vm273_vm4, %v429_v53  ;;  %v442_v55 = vsel %vm219_vm8, %v440_v49, %v430_v52 }
 0x123   : > { %1450 = vmatpush.msk.msrb.mxu2 %vm273_vm4, %v442_v55  ;;  %1453 = vmatmul.msk.f32.vlgmr.msrb.gmra.mxu3 %vm269_vm7, %v171_v51 }
 0x124   : > { %1460 = vmatpush.msk.msra.mxu3 %vm273_vm4, %v445_v54  ;;  %1451 = vmatmul.msk.f32.vlgmr.msrb.gmra.mxu2 %vm269_vm7, %v171_v51  ;;  %v317_v8 = vpop.f32.mrf.mxu1 }
 0x125   : > { %1458 = vmatpush.msk.msra.mxu2 %vm273_vm4, %v440_v49  ;;  %1457 = vmatmul.msk.f32.vlgmr.msra.gmra.mxu1 %vm269_vm7, %v174_v56  ;;  %v297_v9 = vpop.f32.mrf.mxu0 }
 0x126   : > { %1468 = vmatpush.msk.msrb.mxu3 %vm273_vm4, %v251_v28  ;;  %1455 = vmatmul.msk.f32.vlgmr.msra.gmra.mxu0 %vm269_vm7, %v174_v56 }
 0x127   : > { %1466 = vmatpush.msk.msrb.mxu2 %vm273_vm4, %v250_v29  ;;  %v603_v57 = vpop.permute.xlu1 %602 }
 0x128   : > { %v601_v58 = vpop.permute.xlu0 %600 }
 0x129   : > { %v604_v60 = vsel %vm219_vm8, %v601_v58, %v603_v57  ;;  %v605_v2 = vsel %vm219_vm8, %v603_v57, %v601_v58 }
 0x12a   : > { %1464 = vmatpush.msk.msrb.mxu1 %vm273_vm4, %v604_v60 }
 0x12b   : > { %1461 = vmatmul.msk.f32.vlgmr.msra.gmra.mxu3 %vm269_vm7, %v177_v59 }
 0x12c   : > { %1459 = vmatmul.msk.f32.vlgmr.msra.gmra.mxu2 %vm269_vm7, %v177_v59 }
 0x12d   : > { %1465 = vmatmul.msk.f32.vlgmr.msrb.gmra.mxu1 %vm269_vm7, %v172_v61 }
 0x130   : > { %v609_v63 = vpop.permute.xlu0 %608 }
 0x131   : > { %v610_v3 = vsel %vm262_vm9, %v607_v62, %v609_v63  ;;  %v611_v4 = vsel %vm262_vm9, %v609_v63, %v607_v62 }
 0x132   : > { %v612_v5 = vsel %vm219_vm8, %v610_v3, %v605_v2  ;;  %v615_v6 = vsel %vm222_vm10, %v604_v60, %v611_v4 }
 0x133   : > { %1462 = vmatpush.msk.msrb.mxu0 %vm273_vm4, %v612_v5  ;;  %1469 = vmatmul.msk.f32.vlgmr.msrb.gmra.mxu3 %vm269_vm7, %v175_v1 }
 0x134   : > { %1472 = vmatpush.msk.msra.mxu1 %vm273_vm4, %v615_v6  ;;  %1463 = vmatmul.msk.f32.vlgmr.msrb.gmra.mxu0 %vm269_vm7, %v172_v61 }
 0x135   : > { %1467 = vmatmul.msk.f32.vlgmr.msrb.gmra.mxu2 %vm269_vm7, %v175_v1  ;;  %1470 = vmatpush.msk.msra.mxu0 %vm273_vm4, %v610_v3 }
 0x136   : > { %1473 = vmatmul.msk.f32.vlgmr.msra.gmra.mxu1 %vm269_vm7, %v178_v7 }
 0x13c   : > { %1471 = vmatmul.msk.f32.vlgmr.msra.gmra.mxu0 %vm269_vm7, %v178_v7 }
 0x18f   : > { %v366_v14 = vpop.f32.mrf.mxu3 }
 0x190   : > { %v367_v19 = vadd.f32 %v366_v14, %v317_v8 }
 0x199   : > { %v415_v10 = vpop.f32.mrf.mxu1 }
 0x19a   : > { %v395_v13 = vpop.f32.mrf.mxu0  ;;  %v419_v24 = vadd.f32 %v415_v10, %v367_v19 }
 0x19f   : > { %v346_v15 = vpop.f32.mrf.mxu2 }
 0x1a0   : > { %v347_v21 = vadd.f32 %v346_v15, %v297_v9 }
 0x1a2   : > { %v544_v16 = vpop.f32.mrf.mxu1  ;;  %v418_v25 = vadd.f32 %v395_v13, %v347_v21 }
 0x1a3   : > { %v524_v23 = vpop.f32.mrf.mxu0 }
 0x1a6   : > { %v492_v20 = vpop.f32.mrf.mxu3 }
 0x1a7   : > { %v472_v22 = vpop.f32.mrf.mxu2  ;;  %v496_v28 = vadd.f32 %v492_v20, %v419_v24 }
 0x1a8   : > { %v495_v30 = vadd.f32 %v472_v22, %v418_v25  ;;  %v182_v25 = vld [vmem:[%s2060_s2 + $0xc] sm:$0xf] }
 0x1a9   : > { %v548_v32 = vadd.f32 %v544_v16, %v496_v28 }
 0x1aa   : > { %v662_v29 = vpop.f32.mrf.mxu1  ;;  %v547_v34 = vadd.f32 %v524_v23, %v495_v30 }
 0x1ae   : > { %v595_v31 = vpop.f32.mrf.mxu3 }
 0x1af   : > { %v575_v33 = vpop.f32.mrf.mxu2  ;;  %v599_v35 = vadd.f32 %v595_v31, %v548_v32  ;;  %v179_v32 = vld [vmem:[%s2060_s2] sm:$0xf] }
 0x1b0   : > { %v598_v37 = vadd.f32 %v575_v33, %v547_v34 }
 0x1b1   : > { %v642_v36 = vpop.f32.mrf.mxu0  ;;  %v666_v38 = vadd.f32 %v662_v29, %v599_v35 }
 0x1b2   : > { %v665_v41 = vadd.f32 %v642_v36, %v598_v37 }
 0x1b3   : > { %v764_v40 = vpop.f32.mrf.mxu1 }
 0x1b6   : > { %v713_v39 = vpop.f32.mrf.mxu3 }
 0x1b7   : > { %v717_v42 = vadd.f32 %v713_v39, %v666_v38  ;;  %v185_v38 = vld [vmem:[%s2060_s2 + $0x18] sm:$0xf] }
 0x1b8   : > { %v693_v43 = vpop.f32.mrf.mxu2 }
 0x1b9   : > { %v716_v44 = vadd.f32 %v693_v43, %v665_v41  ;;  %v768_v45 = vadd.f32 %v764_v40, %v717_v42  ;;  %v744_v46 = vpop.f32.mrf.mxu0 }
 0x1bb   : > { %v767_v47 = vadd.f32 %v744_v46, %v716_v44  ;;  %v770_v48 = vsel %vm273_vm4, %v768_v45, 0.0 }
 0x1bd   : > { %v769_v49 = vsel %vm273_vm4, %v767_v47, 0.0 }
 0x1be   : > { %v771_v50 = vadd.f32 %v770_v48, %v769_v49  ;;  %v180_v48 = vld [vmem:[%s2060_s2 + $0x4] sm:$0xf] }
 0x1c0   : > { %772 = vadd.xlane.f32.xlu1 %v771_v50 }
 0x233   : > { %v773_v51 = vpop.xlane.xlu1 %772 }
 0x234   : > { %v774_v52 = vmul.f32 0.00390625, %v773_v51  ;;  %v183_v51 = vld [vmem:[%s2060_s2 + $0x10] sm:$0xf] }
 0x236   : > { %v775_v53 = vsub.f32 %v767_v47, %v774_v52  ;;  %v776_v54 = vsub.f32 %v768_v45, %v774_v52 }
 0x238   : > { %v777_v55 = vmul.f32 %v775_v53, %v775_v53  ;;  %v778_v56 = vmul.f32 %v776_v54, %v776_v54 }
 0x23a   : > { %v779_v57 = vsel %vm273_vm4, %v777_v55, 0.0  ;;  %v780_v58 = vsel %vm273_vm4, %v778_v56, 0.0 }
 0x23b   : > { %v781_v59 = vadd.f32 %v780_v58, %v779_v57 }
 0x23d   : > { %782 = vadd.xlane.f32.xlu2 %v781_v59  ;;  %v181_v59 = vld [vmem:[%s2060_s2 + $0x8] sm:$0xf] }
 0x2b0   : > { %v783_v60 = vpop.xlane.xlu2 %782 }
 0x2b1   : > { %v784_v61 = vmul.f32 0.00390625, %v783_v60 }
 0x2b3   : > { %v785_v62 = vadd.f32 1e-05, %v784_v61 }
 0x2b5   : > { %1560 = vrsqrt.f32 %v785_v62  ;;  %vm792_vm12 = vweird.f32 %v785_v62 }
 0x2bb   : > { %v1561_v63 = vpop.eup %1560 }
 0x2bc   : > { %v787_v1 = vmul.f32 %v1561_v63, %v785_v62  ;;  %vm793_vm11 = vweird.f32 %v1561_v63  ;;  %v184_v62 = vld [vmem:[%s2060_s2 + $0x14] sm:$0xf] }
 0x2bd   : > { %vm794_vm13 = vmor %vm792_vm12, %vm793_vm11 }
 0x2be   : > { %v788_v2 = vmul.f32 %v1561_v63, %v787_v1 }
 0x2c0   : > { %v789_v3 = vmul.f32 0.5, %v788_v2 }
 0x2c2   : > { %v790_v4 = vsub.f32 1.5, %v789_v3 }
 0x2c4   : > { %v791_v5 = vmul.f32 %v1561_v63, %v790_v4 }
 0x2c6   : > { %v795_v6 = vsel %vm794_vm13, %v1561_v63, %v791_v5 }
 0x2c7   : > { %v796_v7 = vmul.f32 %v795_v6, %v775_v53  ;;  %v797_v9 = vmul.f32 %v795_v6, %v776_v54  ;;  %v186_v53 = vld [vmem:[%s2060_s2 + $0x1c] sm:$0xf] }
 0x2c9   : > { %v1875_v8 = vmax.f32 %v796_v7, 0.0  ;;  %v1879_v10 = vmax.f32 %v797_v9, 0.0 }
 0x2cb   : > { %800 = vrot.lane.b32.xlu0 %v1875_v8, %s1628_s29 }
 0x2d3   : > { %802 = vrot.lane.b32.xlu0 %v1879_v10, %s1628_s29  ;;  %s161_s29 = sand.u32 1, %s1618_s13  }
 0x2d4   : > { %s1356_s16 = scalar_lea.sflag [#allocation3], %s161_s29 }
 0x2db   : > { %806 = vrot.lane.b32.xlu0 %v1875_v8, %s1629_s30 }
 0x2e3   : > { %808 = vrot.lane.b32.xlu0 %v1879_v10, %s1629_s30  ;;  %s1435_s30 = sshll.u32 %s161_s29, 3 }
 0x2e4   : > { %s163_s17 = scalar_lea.vmem [#allocation2], %s1435_s30 }
 0x2e5   : > { %s1369_s19 = sshll.u32 %s163_s17, 4  ;;  %s1370_s19 = int_to_ptr.vmem [resolvable:$true] %s1369_s19 }
 0x2eb   : > { %981 = vrot.lane.b32.xlu0 %v1875_v8, %s1630_s4 }
 0x2f3   : > { %983 = vrot.lane.b32.xlu0 %v1879_v10, %s1630_s4 }
 0x33d   : > { %v801_v13 = vpop.permute.xlu0 %800 }
 0x345   : > { %v803_v14 = vpop.permute.xlu0 %802 }
 0x346   : > { %v804_v19 = vsel %vm233_vm0, %v801_v13, %v803_v14  ;;  %v805_v20 = vsel %vm233_vm0, %v803_v14, %v801_v13 }
 0x34d   : > { %v807_v15 = vpop.permute.xlu0 %806 }
 0x355   : > { %v809_v16 = vpop.permute.xlu0 %808 }
 0x356   : > { %v810_v21 = vsel %vm245_vm1, %v807_v15, %v809_v16  ;;  %v811_v22 = vsel %vm245_vm1, %v809_v16, %v807_v15 }
 0x357   : > { %v813_v23 = vsel %vm1726_vm2, %v811_v22, %v804_v19  ;;  %v812_v24 = vsel %vm1730_vm3, %v810_v21, %v805_v20  ;;  %v815_v17 = vsel %vm1754_vm5, %v804_v19, %v811_v22  ;;  %v814_v18 = vsel %vm1758_vm6, %v805_v20, %v810_v21 }
 0x358   : > { %818 = vrot.lane.b32.xlu2 %v813_v23, %s1630_s4  ;;  %1476 = vmatpush.msk.msra.mxu3 %vm273_vm4, %v813_v23 }
 0x359   : > { %822 = vrot.lane.b32.xlu1 %v812_v24, %s1631_s5  ;;  %816 = vrot.lane.b32.xlu0 %v812_v24, %s1630_s4 }
 0x35a   : > { %1474 = vmatpush.msk.msra.mxu2 %vm273_vm4, %v812_v24  ;;  %1477 = vmatmul.msk.f32.vlgmr.msra.gmra.mxu3 %vm269_vm7, %v182_v25 }
 0x35b   : > { %1475 = vmatmul.msk.f32.vlgmr.msra.gmra.mxu2 %vm269_vm7, %v182_v25 }
 0x35d   : > { %v982_v26 = vpop.permute.xlu0 %981 }
 0x360   : > { %987 = vrot.lane.b32.xlu2 %v1875_v8, %s1631_s5 }
 0x361   : > { %989 = vrot.lane.b32.xlu1 %v1879_v10, %s1631_s5  ;;  %824 = vrot.lane.b32.xlu0 %v813_v23, %s1631_s5 }
 0x365   : > { %v984_v28 = vpop.permute.xlu0 %983 }
 0x366   : > { %v985_v33 = vsel %vm219_vm8, %v982_v26, %v984_v28  ;;  %v986_v43 = vsel %vm219_vm8, %v984_v28, %v982_v26 }
 0x368   : > { %1152 = vrot.lane.b32.xlu2 %v815_v17, %s1630_s4 }
 0x369   : > { %1156 = vrot.lane.b32.xlu1 %v814_v18, %s1631_s5  ;;  %1150 = vrot.lane.b32.xlu0 %v814_v18, %s1630_s4 }
 0x371   : > { %1158 = vrot.lane.b32.xlu0 %v815_v17, %s1631_s5 }
 0x3b2   : > { %v819_v29 = vpop.permute.xlu2 %818 }
 0x3ba   : > { %v988_v34 = vpop.permute.xlu2 %987 }
 0x3c2   : > { %v1153_v49 = vpop.permute.xlu2 %1152 }
 0x3cb   : > { %v823_v30 = vpop.permute.xlu1 %822  ;;  %v817_v27 = vpop.permute.xlu0 %816 }
 0x3cc   : > { %v820_v31 = vsel %vm219_vm8, %v817_v27, %v819_v29  ;;  %v821_v35 = vsel %vm219_vm8, %v819_v29, %v817_v27 }
 0x3cd   : > { %1480 = vmatpush.msk.msrb.mxu1 %vm273_vm4, %v820_v31 }
 0x3ce   : > { %1481 = vmatmul.msk.f32.vlgmr.msrb.gmra.mxu1 %vm269_vm7, %v179_v32 }
 0x3cf   : > { %1488 = vmatpush.msk.msra.mxu1 %vm273_vm4, %v985_v33 }
 0x3d3   : > { %v990_v36 = vpop.permute.xlu1 %989  ;;  %v825_v37 = vpop.permute.xlu0 %824 }
 0x3d4   : > { %v991_v39 = vsel %vm262_vm9, %v988_v34, %v990_v36  ;;  %v992_v40 = vsel %vm262_vm9, %v990_v36, %v988_v34  ;;  %v826_v41 = vsel %vm262_vm9, %v823_v30, %v825_v37  ;;  %v827_v42 = vsel %vm262_vm9, %v825_v37, %v823_v30 }
 0x3d5   : > { %v996_v44 = vsel %vm222_vm10, %v985_v33, %v992_v40  ;;  %v828_v45 = vsel %vm219_vm8, %v826_v41, %v821_v35  ;;  %v831_v46 = vsel %vm222_vm10, %v820_v31, %v827_v42  ;;  %1482 = vmatpush.msk.msrb.mxu2 %vm273_vm4, %v826_v41  ;;  %v993_v47 = vsel %vm219_vm8, %v991_v39, %v986_v43 }
 0x3d6   : > { %1478 = vmatpush.msk.msrb.mxu0 %vm273_vm4, %v828_v45  ;;  %1483 = vmatmul.msk.f32.vlgmr.msrb.gmra.mxu2 %vm269_vm7, %v185_v38 }
 0x3d7   : > { %1484 = vmatpush.msk.msrb.mxu3 %vm273_vm4, %v831_v46  ;;  %1490 = vmatpush.msk.msra.mxu2 %vm273_vm4, %v1875_v8 }
 0x3d8   : > { %1496 = vmatpush.msk.msrb.mxu1 %vm273_vm4, %v996_v44  ;;  %1479 = vmatmul.msk.f32.vlgmr.msrb.gmra.mxu0 %vm269_vm7, %v179_v32 }
 0x3d9   : > { %1485 = vmatmul.msk.f32.vlgmr.msrb.gmra.mxu3 %vm269_vm7, %v185_v38  ;;  %1486 = vmatpush.msk.msra.mxu0 %vm273_vm4, %v993_v47 }
 0x3da   : > { %1489 = vmatmul.msk.f32.vlgmr.msra.gmra.mxu1 %vm269_vm7, %v180_v48  ;;  %1492 = vmatpush.msk.msra.mxu3 %vm273_vm4, %v1879_v10 }
 0x3db   : > { %1504 = vmatpush.msk.msra.mxu1 %vm273_vm4, %v815_v17  ;;  %1494 = vmatpush.msk.msrb.mxu0 %vm273_vm4, %v991_v39  ;;  %v1151_v50 = vpop.permute.xlu0 %1150  ;;  %v1157_v54 = vpop.permute.xlu1 %1156 }
 0x3dc   : > { %v1154_v52 = vsel %vm219_vm8, %v1151_v50, %v1153_v49  ;;  %v1155_v56 = vsel %vm219_vm8, %v1153_v49, %v1151_v50 }
 0x3dd   : > { %1500 = vmatpush.msk.msrb.mxu3 %vm273_vm4, %v1154_v52  ;;  %v878_v63 = vpop.f32.mrf.mxu3 }
 0x3de   : > { %1491 = vmatmul.msk.f32.vlgmr.msra.gmra.mxu2 %vm269_vm7, %v183_v51  ;;  %v858_v12 = vpop.f32.mrf.mxu2 }
 0x3e0   : > { %1487 = vmatmul.msk.f32.vlgmr.msra.gmra.mxu0 %vm269_vm7, %v180_v48 }
 0x3e1   : > { %1493 = vmatmul.msk.f32.vlgmr.msra.gmra.mxu3 %vm269_vm7, %v183_v51  ;;  %1502 = vmatpush.msk.msra.mxu0 %vm273_vm4, %v814_v18 }
 0x3e2   : > { %1497 = vmatmul.msk.f32.vlgmr.msrb.gmra.mxu1 %vm269_vm7, %v186_v53 }
 0x3e3   : > { %v1159_v55 = vpop.permute.xlu0 %1158 }
 0x3e4   : > { %v1160_v57 = vsel %vm262_vm9, %v1157_v54, %v1159_v55  ;;  %v1161_v58 = vsel %vm262_vm9, %v1159_v55, %v1157_v54 }
 0x3e5   : > { %v1162_v60 = vsel %vm219_vm8, %v1160_v57, %v1155_v56  ;;  %v1165_v61 = vsel %vm222_vm10, %v1154_v52, %v1161_v58 }
 0x3e6   : > { %1498 = vmatpush.msk.msrb.mxu2 %vm273_vm4, %v1162_v60  ;;  %1508 = vmatpush.msk.msra.mxu3 %vm273_vm4, %v1165_v61 }
 0x3e7   : > { %1499 = vmatmul.msk.f32.vlgmr.msrb.gmra.mxu2 %vm269_vm7, %v181_v59 }
 0x3e8   : > { %1495 = vmatmul.msk.f32.vlgmr.msrb.gmra.mxu0 %vm269_vm7, %v186_v53  ;;  %1506 = vmatpush.msk.msra.mxu2 %vm273_vm4, %v1160_v57 }
 0x3e9   : > { %1501 = vmatmul.msk.f32.vlgmr.msrb.gmra.mxu3 %vm269_vm7, %v181_v59 }
 0x3ea   : > { %1505 = vmatmul.msk.f32.vlgmr.msra.gmra.mxu1 %vm269_vm7, %v184_v62 }
 0x3ef   : > { %1507 = vmatmul.msk.f32.vlgmr.msra.gmra.mxu2 %vm269_vm7, %v187_v11 }
 0x3f0   : > { %1503 = vmatmul.msk.f32.vlgmr.msra.gmra.mxu0 %vm269_vm7, %v184_v62 }
 0x3f1   : > { %1509 = vmatmul.msk.f32.vlgmr.msra.gmra.mxu3 %vm269_vm7, %v187_v11 }
 0x44b   : > { %v927_v1 = vpop.f32.mrf.mxu1 }
 0x44c   : > { %v928_v8 = vadd.f32 %v927_v1, %v878_v63 }
 0x455   : > { %v907_v2 = vpop.f32.mrf.mxu0 }
 0x456   : > { %v908_v7 = vadd.f32 %v907_v2, %v858_v12 }
 0x457   : > { %v1043_v5 = vpop.f32.mrf.mxu1 }
 0x459   : > { %v956_v3 = vpop.f32.mrf.mxu2 }
 0x45a   : > { %v979_v9 = vadd.f32 %v956_v3, %v908_v7 }
 0x45c   : > { %v976_v4 = vpop.f32.mrf.mxu3 }
 0x45d   : > { %v1023_v6 = vpop.f32.mrf.mxu0  ;;  %v980_v13 = vadd.f32 %v976_v4, %v928_v8 }
 0x45e   : > { %v1046_v15 = vadd.f32 %v1023_v6, %v979_v9 }
 0x45f   : > { %v1145_v19 = vpop.f32.mrf.mxu1  ;;  %v1047_v20 = vadd.f32 %v1043_v5, %v980_v13 }
 0x461   : > { %v1074_v10 = vpop.f32.mrf.mxu2 }
 0x462   : > { %v1097_v21 = vadd.f32 %v1074_v10, %v1046_v15 }
 0x464   : > { %v1094_v14 = vpop.f32.mrf.mxu3 }
 0x465   : > { %v1125_v16 = vpop.f32.mrf.mxu0  ;;  %v1098_v22 = vadd.f32 %v1094_v14, %v1047_v20 }
 0x466   : > { %v1148_v24 = vadd.f32 %v1125_v16, %v1097_v21 }
 0x467   : > { %v1149_v18 = vadd.f32 %v1145_v19, %v1098_v22  ;;  %v1263_v29 = vpop.f32.mrf.mxu1 }
 0x46a   : > { %v1192_v23 = vpop.f32.mrf.mxu2 }
 0x46b   : > { %v1215_v25 = vadd.f32 %v1192_v23, %v1148_v24 }
 0x46c   : > { %v1212_v17 = vpop.f32.mrf.mxu3 }
 0x46d   : > { %v1243_v26 = vpop.f32.mrf.mxu0  ;;  %v1216_v28 = vadd.f32 %v1212_v17, %v1149_v18 }
 0x46e   : > { %v1266_v30 = vadd.f32 %v1243_v26, %v1215_v25 }
 0x46f   : > { %v1267_v31 = vadd.f32 %v1263_v29, %v1216_v28 }
 0x472   : > { %v1294_v27 = vpop.f32.mrf.mxu2 }
 0x473   : > { %v1317_v32 = vadd.f32 %v1294_v27, %v1266_v30 }
 0x474   : > { %v1314_v33 = vpop.f32.mrf.mxu3 }
 0x475   : > { %v1318_v34 = vadd.f32 %v1314_v33, %v1267_v31  ;;  %v1319_v35 = vsel %vm273_vm4, %v1317_v32, 0.0 }
 0x477   : > { %v1320_v36 = vsel %vm273_vm4, %v1318_v34, 0.0 }
 0x478   : > { %v1321_v37 = vadd.f32 %v1320_v36, %v1319_v35 }
 0x47a   : > { %1322 = vadd.xlane.f32.xlu2 %v1321_v37 }
 0x4ed   : > { %v1323_v38 = vpop.xlane.xlu2 %1322 }
 0x4ee   : > { %v1324_v39 = vmul.f32 0.00390625, %v1323_v38 }
 0x4f0   : > { %v1325_v40 = vsub.f32 %v1317_v32, %v1324_v39  ;;  %v1326_v41 = vsub.f32 %v1318_v34, %v1324_v39 }
 0x4f2   : > { %v1327_v42 = vmul.f32 %v1325_v40, %v1325_v40  ;;  %v1328_v43 = vmul.f32 %v1326_v41, %v1326_v41 }
 0x4f4   : > { %v1329_v44 = vsel %vm273_vm4, %v1327_v42, 0.0  ;;  %v1330_v45 = vsel %vm273_vm4, %v1328_v43, 0.0 }
 0x4f5   : > { %v1331_v46 = vadd.f32 %v1330_v45, %v1329_v44 }
 0x4f7   : > { %1332 = vadd.xlane.f32.xlu1 %v1331_v46 }
 0x56a   : > { %v1333_v47 = vpop.xlane.xlu1 %1332 }
 0x56b   : > { %v1334_v48 = vmul.f32 0.00390625, %v1333_v47 }
 0x56d   : > { %v1335_v49 = vadd.f32 1e-05, %v1334_v48 }
 0x56f   : > { %1562 = vrsqrt.f32 %v1335_v49  ;;  %vm1342_vm15 = vweird.f32 %v1335_v49 }
 0x575   : > { %v1563_v50 = vpop.eup %1562 }
 0x576   : > { %v1337_v51 = vmul.f32 %v1563_v50, %v1335_v49  ;;  %vm1343_vm14 = vweird.f32 %v1563_v50 }
 0x577   : > { %vm1344_vm0 = vmor %vm1342_vm15, %vm1343_vm14 }
 0x578   : > { %v1338_v52 = vmul.f32 %v1563_v50, %v1337_v51 }
 0x57a   : > { %v1339_v53 = vmul.f32 0.5, %v1338_v52 }
 0x57c   : > { %v1340_v54 = vsub.f32 1.5, %v1339_v53 }
 0x57e   : > { %v1341_v55 = vmul.f32 %v1563_v50, %v1340_v54 }
 0x580   : > { %v1345_v56 = vsel %vm1344_vm0, %v1563_v50, %v1341_v55 }
 0x581   : > { %v1347_v57 = vmul.f32 %v1345_v56, %v1326_v41  ;;  %v1346_v58 = vmul.f32 %v1345_v56, %v1325_v40 }
 0x583   : > { %v1350_v59 = vrot.slane %v1347_v57, 4 }
 0x585   : > { %v1351_v60 = vsel %vm273_vm4, %v1346_v58, %v1350_v59 }
 0x586   : > { %v1353_v61 = vadd.f32 %v1351_v60, %v1705_v0 }
 0x588   : > { %1354 = vst [vmem:[%s163_s17] sm:$0xff] %v1353_v61 }
 0x589   : > { %1591 = shalt.err (!%p1588_p3)
}
 0x58a   : > { %1517 = dma.vmem_to_hbm [thread:$0]  (%p1690_p5), %s1370_s19, 128, %s1372_s20, %s1356_s16  }
 0x58b PF: > { %p1523_p4 = scmp.ge.s32.totalorder %s1626_s15, 2  ;;  %s1383_s8 = sand.u32 1, %s1614_s12  }
 0x58c   : > { %s1384_s9 = scalar_lea.sflag [#allocation3], %s1383_s8 }
 0x58d   : > { %p1520_p7 = pnand %p1523_p4, %p1694_p6 }
 0x58f   : > { %p1521_p8 = pneg %p1520_p7 }
 0x591   : > { %1609 = dma.done.wait (%p1521_p8), %s1384_s9, 128  }
 0x592   : > { %1611 = vsyncadd (%p1521_p8), %s1384_s9, 4294967168  ;;  %p13_p9 = scmp.ge.s32.totalorder %s1677_s18, 4   ;;  %s2072_s12 = smov %s1618_s13 }
 0x593   : > { %s2073_s13 = smov %s1622_s14  ;;  %s2074_s14 = smov %s1688_s21 }
 0x594   : > { %s2075_s15 = smov %s1677_s18  ;;  %15 = sbr.rel (!%p13_p9) target bundleno = 3 (0x3), region = 67 }
 0x599   :  { %1390 = vsyncpa [#allocation3], 1 }
 0x59a   :  { %1392 = vsyncpa [#allocation3 + $0x1], 1 }

</bundles_post_ra>
